<compile_context>
chip_gen: v5e
topology: v5e:2x2
jax: 0.10.0
libtpu: 0.0.40
codegen_flags: <defaults>
</compile_context>

<pallas_src>
import functools

import jax
import jax.numpy as jnp
import numpy as np
from jax.experimental import pallas as pl
from jax.experimental.pallas import tpu as pltpu


# ----------------------------- Pallas kernel ------------------------------ #
def weighted_ce_kernel(tgt_ref, w_ref, logits_ref, out_ref, *,
                       num_rows, tile_rows, first_masked_block):
    """One grid step reduces a [TR, N] logits tile to one scalar partial sum.

    tgt_ref   : [TR, 1]     int32   target ids (padded rows -> 0)
    w_ref     : [TR, 1]     float32 per-row weights (padded rows -> 0)
    logits_ref: [TR, N]     model-dtype logits (cast to f32 per tile)
    out_ref   : [1, 8, 128] float32 lane-dense per-core running sum
    """
    c = pl.program_id(0)            # parallel (megacore) axis
    i = pl.program_id(1)            # sequential reduction axis
    inner = pl.num_programs(1)
    b = c * inner + i               # global block index

    @pl.when(i == 0)
    def _():
        out_ref[...] = jnp.zeros_like(out_ref)

    x = logits_ref[...].astype(jnp.float32)                        # [TR, N]
    w = w_ref[...]                                                 # [TR, 1]
    tgt = tgt_ref[...]                                             # [TR, 1]
    col = jax.lax.broadcasted_iota(jnp.int32, (1, x.shape[-1]), 1)  # (1, N)

    def partial_sum(xv, wv):
        # Target gather taken from xv (pre max-subtraction) so the compare /
        # select / lane-reduce can co-issue with the max/sub/exp chain.
        m = jnp.max(xv, axis=-1, keepdims=True)                    # [TR, 1]
        sumexp = jnp.sum(jnp.exp(xv - m), axis=-1, keepdims=True)  # [TR, 1]
        x_tgt = jnp.sum(jnp.where(col == tgt, xv, 0.0),
                        axis=-1, keepdims=True)                    # [TR, 1]
        # TODO(synk): no ignore_index / target-bounds semantics (the torch
        # module never uses one).
        nll = jnp.log(sumexp) + m - x_tgt                          # [TR, 1]
        return jnp.sum(nll * wv)                                   # scalar

    if first_masked_block is None:
        # Fast path: every block is fully in-bounds.
        out_ref[...] += partial_sum(x, w)
    else:
        # Only the tail / phantom blocks pay for the dense mask.
        @pl.when(b < first_masked_block)
        def _():
            out_ref[...] += partial_sum(x, w)

        @pl.when(b >= first_masked_block)
        def _():
            row = (b * tile_rows
                   + jax.lax.broadcasted_iota(jnp.int32, (tile_rows, 1), 0))
            valid = row < num_rows                                 # [TR, 1]
            # Mask BOTH x and w: OOB DMA bytes can be Inf/NaN and w=0 alone
            # would not stop NaN propagation (0 * NaN = NaN).
            xm = jnp.where(valid, x, 0.0)
            wm = jnp.where(valid, w, 0.0)
            out_ref[...] += partial_sum(xm, wm)


# --------------------------- sizing heuristics ----------------------------- #
def _device_profile():
    """(physical VMEM bytes per TensorCore, is multi-TensorCore device)."""
    try:
        kind = jax.devices()[0].device_kind.lower()
    except Exception:
        kind = ""
    if "v7" in kind:
        return 64 << 20, True                     # v7x: 64 MiB / TC, 2 TCs
    if "v2" in kind or "v3" in kind:
        return 16 << 20, False
    if any(g in kind for g in ("v4", "v5", "v6")):
        multi = ("v4" in kind) or ("v5p" in kind)  # megacore parts
        return 128 << 20, multi                    # v5e / v6e: 128 MiB, 1 TC
    return 64 << 20, False                         # unknown: be conservative


def _row_vmem_bytes(n_cols, itemsize):
    """Per-row VMEM footprint estimate for the tile budget."""
    n_pad = pl.cdiv(max(n_cols, 1), 128) * 128
    return (2 * n_pad * itemsize      # double-buffered logits block
            + 3 * n_pad * 4           # in-kernel f32 temporaries (x, exp, sel)
            + 2 * 2 * 128 * 4)        # double-buffered lane-padded [TR,1] t/w


def _pick_tile_rows(n_rows, n_cols, itemsize, *, phys_vmem, max_rows=8192):
    """Largest row tile (multiple of 16) within the per-generation budget."""
    n_pad = pl.cdiv(max(n_cols, 1), 128) * 128
    # ~8 MiB logits block on 128-MiB-VMEM parts, ~3 MiB on 64-MiB parts.
    if phys_vmem >= (128 << 20):
        target_logits = 8 << 20
    else:
        target_logits = max(1 << 20, phys_vmem // 20)
    budget = max(2 << 20, phys_vmem // 4)
    row_bytes = _row_vmem_bytes(n_cols, itemsize)
    tr = min(target_logits // max(1, n_pad * itemsize),
             budget // row_bytes, max_rows)
    tr = (int(max(16, tr)) // 16) * 16          # multiple of 16 (bf16 packing)
    if n_rows >= 16:
        tr = min(tr, (n_rows // 16) * 16)
    elif n_rows >= 8:
        tr = min(tr, 8)
    return max(8, tr)


# ------------------------------- wrapper ----------------------------------- #
def weighted_ce_pallas(logits_flat, target_flat, weight_flat, *,
                       num_splits=None, tile_rows=None):
    """logits_flat: [R, N] (any float dtype), target_flat/weight_flat: [R]."""
    R, N = logits_flat.shape
    itemsize = jnp.dtype(logits_flat.dtype).itemsize
    phys_vmem, multi_tc = _device_profile()

    if tile_rows is None:
        tile_rows = _pick_tile_rows(R, N, itemsize, phys_vmem=phys_vmem)
    tile_rows = int(tile_rows)

    total_blocks = pl.cdiv(R, tile_rows)
    if num_splits is None:
        num_splits = 2 if (multi_tc and total_blocks >= 2) else 1
    splits = int(max(1, min(num_splits, total_blocks)))
    inner = pl.cdiv(total_blocks, splits)
    eff_blocks = splits * inner
    Rp = eff_blocks * tile_rows
    need_mask = (Rp != R)
    first_masked = (R // tile_rows) if need_mask else None
    last_block = total_blocks - 1

    t = target_flat.reshape(R, 1).astype(jnp.int32)
    w = weight_flat.reshape(R, 1).astype(jnp.float32)
    if Rp != R:
        # Only the tiny [R, 1] side arrays are padded; the [R, N] logits slab
        # is streamed unpadded and its ragged tail is masked in-kernel.
        t = jnp.pad(t, ((0, Rp - R), (0, 0)))
        w = jnp.pad(w, ((0, Rp - R), (0, 0)))

    def side_map(c, i):
        return (c * inner + i, 0)

    def logits_map(c, i):
        b = c * inner + i
        return (jnp.minimum(b, last_block), 0)   # clamp phantom tail blocks

    kernel = functools.partial(
        weighted_ce_kernel, num_rows=R, tile_rows=tile_rows,
        first_masked_block=first_masked)

    est_bytes = tile_rows * _row_vmem_bytes(N, itemsize) + (2 << 20)
    cap = max(8 << 20, min(phys_vmem - (16 << 20), 100 << 20))
    vmem_limit = int(min(cap, max(32 << 20, est_bytes + (8 << 20))))

    out = pl.pallas_call(
        kernel,
        out_shape=jax.ShapeDtypeStruct((splits, 8, 128), jnp.float32),
        grid_spec=pltpu.PrefetchScalarGridSpec(
            num_scalar_prefetch=0,
            grid=(splits, inner),
            in_specs=[
                pl.BlockSpec((tile_rows, 1), side_map),     # target ids
                pl.BlockSpec((tile_rows, 1), side_map),     # weights
                pl.BlockSpec((tile_rows, N), logits_map),   # logits (model dtype)
            ],
            out_specs=pl.BlockSpec((1, 8, 128), lambda c, i: (c, 0, 0)),
        ),
        compiler_params=pltpu.CompilerParams(
            dimension_semantics=("parallel", "arbitrary"),
            vmem_limit_bytes=vmem_limit),
    )(t, w, logits_flat)
    return jnp.sum(out[:, 0, 0])


# --------------------------- weight computation ---------------------------- #
def compute_weight(target, *, xyz_id, lig_id, end_id,
                   pocket_atom_weight, pocket_coord_weight,
                   lig_smiles_weight, lig_coord_weight):
    """target: [L, B] int32 -> weight: [L, B] float32 (matches torch code)."""
    L, B = target.shape
    coord_count = jnp.cumsum((target == xyz_id).astype(jnp.int32), axis=0)
    lig_count = jnp.cumsum((target == lig_id).astype(jnp.int32), axis=0)
    end_count = jnp.cumsum((target == end_id).astype(jnp.int32), axis=0)

    w = jnp.full(target.shape, pocket_atom_weight, dtype=jnp.float32)
    w = jnp.where(coord_count >= 1, pocket_coord_weight, w)
    w = jnp.where(lig_count >= 1, lig_smiles_weight, w)
    w = jnp.where(coord_count >= 2, lig_coord_weight, w)
    w = jnp.where(end_count >= 1, 0.0, w)
    # shift down by one; first row is pocket_atom_weight
    w = jnp.concatenate(
        [jnp.full((1, B), pocket_atom_weight, dtype=jnp.float32), w[:-1]],
        axis=0)
    return w


@functools.partial(jax.jit, static_argnames=("xyz_id", "lig_id", "end_id",
                                              "tile_rows", "num_splits"))
def weighted_ce_loss(logits, target, *, xyz_id, lig_id, end_id,
                     pocket_atom_weight, pocket_coord_weight,
                     lig_smiles_weight, lig_coord_weight,
                     tile_rows=None, num_splits=None):
    """Full WeightedCELoss.forward. logits: [L, B, N], target: [L, B]."""
    L, B, N = logits.shape
    weight = compute_weight(
        target, xyz_id=xyz_id, lig_id=lig_id, end_id=end_id,
        pocket_atom_weight=pocket_atom_weight,
        pocket_coord_weight=pocket_coord_weight,
        lig_smiles_weight=lig_smiles_weight,
        lig_coord_weight=lig_coord_weight)
    # NOTE: logging / self.step bookkeeping in the torch module has no effect
    # on the returned value and is omitted.
    return weighted_ce_pallas(
        logits.reshape(L * B, N),
        target.reshape(L * B),
        weight.reshape(L * B),
        tile_rows=tile_rows, num_splits=num_splits)


# --------------------------------- main ------------------------------------ #
if __name__ == "__main__":
    VOC_SIZE = 128
    XYZ_ID, LIGAND_ID, END_ID = 5, 6, 7
    PAW, PCW, LSW, LCW = 1.0, 0.5, 2.0, 1.5

    def reference(logits, target):
        weight = compute_weight(
            target, xyz_id=XYZ_ID, lig_id=LIGAND_ID, end_id=END_ID,
            pocket_atom_weight=PAW, pocket_coord_weight=PCW,
            lig_smiles_weight=LSW, lig_coord_weight=LCW)
        N = logits.shape[-1]
        xf = logits.astype(jnp.float32).reshape(-1, N)
        tf = target.reshape(-1)
        lse = jax.scipy.special.logsumexp(xf, axis=-1)
        nll = lse - jnp.take_along_axis(xf, tf[:, None], axis=-1)[:, 0]
        return jnp.sum(nll * weight.reshape(-1))

    def run_case(Lm1, B, dtype, key, **pallas_kw):
        k_logits, k_target = jax.random.split(key)
        logits = jax.random.normal(
            k_logits, (Lm1, B, VOC_SIZE), dtype=jnp.float32).astype(dtype)
        target = jax.random.randint(
            k_target, (Lm1, B), 8, VOC_SIZE, dtype=jnp.int32)
        # sprinkle in special tokens so every weight branch is exercised
        target = target.at[2, 0].set(XYZ_ID)
        target = target.at[4, 0].set(LIGAND_ID)
        target = target.at[5, 0].set(XYZ_ID)
        target = target.at[min(6, Lm1 - 1), 0].set(END_ID)
        target = target.at[3, 1].set(LIGAND_ID)
        target = target.at[min(6, Lm1 - 1), 1].set(XYZ_ID)

        loss = weighted_ce_loss(
            logits, target,
            xyz_id=XYZ_ID, lig_id=LIGAND_ID, end_id=END_ID,
            pocket_atom_weight=PAW, pocket_coord_weight=PCW,
            lig_smiles_weight=LSW, lig_coord_weight=LCW,
            **pallas_kw)
        loss = jax.block_until_ready(loss)
        ref = reference(logits, target)
        np.testing.assert_allclose(np.asarray(loss), np.asarray(ref),
                                   rtol=1e-4, atol=1e-3)

    key = jax.random.PRNGKey(0)
    k1, k2, k3 = jax.random.split(key, 3)
    # Case A: aligned rows (R = 16), f32 logits — single block, no-mask path.
    run_case(8, 2, jnp.float32, k1)
    # Case B: ragged rows (R = 27), bf16 logits — gated in-kernel masking and
    # bf16 streaming (no wrapper upcast).
    run_case(9, 3, jnp.bfloat16, k2)
    # Case C: larger R (320) with a forced small tile + 2-way split —
    # exercises multi-block accumulation, the parallel axis, phantom-block
    # clamping and the masked tail path.
    run_case(40, 8, jnp.bfloat16, k3, tile_rows=64, num_splits=2)

    print("KERNEL_OK")
</pallas_src>

<mosaic_0001>
module attributes {stable_mosaic.version = 11 : i64} {
  func.func @weighted_ce_kernel(%arg0: i32, %arg1: i32, %arg2: memref<16x1xi32, #tpu.memory_space<vmem>>, %arg3: memref<16x1xf32, #tpu.memory_space<vmem>>, %arg4: memref<16x128xf32, #tpu.memory_space<vmem>>, %arg5: memref<1x8x128xf32, #tpu.memory_space<vmem>>) attributes {dimension_semantics = [#tpu.dimension_semantics<parallel>, #tpu.dimension_semantics<arbitrary>], iteration_bounds = array<i64: 1, 1>, scalar_prefetch = 0 : i64, scratch_operands = 0 : i64, tpu.core_type = #tpu.core_type<tc>, window_params = [{transform_indices = @transform_0, window_bounds = array<i64: 16, 1>}, {transform_indices = @transform_1, window_bounds = array<i64: 16, 1>}, {transform_indices = @transform_2, window_bounds = array<i64: 16, 128>}, {transform_indices = @transform_3, window_bounds = array<i64: 1, 8, 128>}]} {
    %c0_i32 = arith.constant 0 : i32
    %0 = arith.cmpi eq, %arg1, %c0_i32 : i32
    %1 = arith.extui %0 : i1 to i32
    %c0_i32_0 = arith.constant 0 : i32
    %2 = arith.cmpi ne, %1, %c0_i32_0 : i32
    scf.if %2 {
      %cst_16 = arith.constant 0.000000e+00 : f32
      %33 = vector.broadcast %cst_16 : f32 to vector<1x8x128xf32>
      %c0_17 = arith.constant 0 : index
      %c0_18 = arith.constant 0 : index
      %c0_19 = arith.constant 0 : index
      %34 = vector.load %arg5[%c0_17, %c0_18, %c0_19] : memref<1x8x128xf32, #tpu.memory_space<vmem>>, vector<1x8x128xf32>
      tpu.vector_store %arg5[%c0_17, %c0_18, %c0_19], %33 {strides = array<i32>} : memref<1x8x128xf32, #tpu.memory_space<vmem>>, vector<1x8x128xf32>,
    } else {
    }
    %c0 = arith.constant 0 : index
    %c0_1 = arith.constant 0 : index
    %3 = vector.load %arg4[%c0, %c0_1] : memref<16x128xf32, #tpu.memory_space<vmem>>, vector<16x128xf32>
    %c0_2 = arith.constant 0 : index
    %c0_3 = arith.constant 0 : index
    %4 = vector.load %arg3[%c0_2, %c0_3] : memref<16x1xf32, #tpu.memory_space<vmem>>, vector<16x1xf32>
    %c0_4 = arith.constant 0 : index
    %c0_5 = arith.constant 0 : index
    %5 = vector.load %arg2[%c0_4, %c0_5] : memref<16x1xi32, #tpu.memory_space<vmem>>, vector<16x1xi32>
    %6 = tpu.iota {dimensions = array<i32: 1>} : vector<1x128xi32>
    %c0_6 = arith.constant 0 : index
    %c0_7 = arith.constant 0 : index
    %c0_8 = arith.constant 0 : index
    %7 = vector.load %arg5[%c0_6, %c0_7, %c0_8] : memref<1x8x128xf32, #tpu.memory_space<vmem>>, vector<1x8x128xf32>
    %cst = arith.constant dense<0xFF800000> : vector<16xf32>
    %8 = vector.multi_reduction <maximumf>, %3, %cst [1] : vector<16x128xf32> to vector<16xf32>
    %9 = vector.shape_cast %8 : vector<16xf32> to vector<16x1xf32>
    %10 = vector.broadcast %9 : vector<16x1xf32> to vector<16x128xf32>
    %11 = arith.subf %3, %10 : vector<16x128xf32>
    %12 = math.exp %11 : vector<16x128xf32>
    %cst_9 = arith.constant dense<0.000000e+00> : vector<16xf32>
    %13 = vector.multi_reduction <add>, %12, %cst_9 [1] : vector<16x128xf32> to vector<16xf32>
    %14 = vector.shape_cast %13 : vector<16xf32> to vector<16x1xf32>
    %15 = vector.broadcast %6 : vector<1x128xi32> to vector<16x128xi32>
    %16 = vector.broadcast %5 : vector<16x1xi32> to vector<16x128xi32>
    %17 = arith.cmpi eq, %15, %16 : vector<16x128xi32>
    %cst_10 = arith.constant 0.000000e+00 : f32
    %18 = vector.broadcast %cst_10 : f32 to vector<16x128xf32>
    %19 = arith.select %17, %3, %18 : vector<16x128xi1>, vector<16x128xf32>
    %cst_11 = arith.constant dense<0.000000e+00> : vector<16xf32>
    %20 = vector.multi_reduction <add>, %19, %cst_11 [1] : vector<16x128xf32> to vector<16xf32>
    %21 = vector.shape_cast %20 : vector<16xf32> to vector<16x1xf32>
    %22 = math.log %14 : vector<16x1xf32>
    %23 = arith.addf %22, %9 : vector<16x1xf32>
    %24 = arith.subf %23, %21 : vector<16x1xf32>
    %25 = arith.mulf %24, %4 : vector<16x1xf32>
    %26 = vector.shape_cast %25 : vector<16x1xf32> to vector<1x16x1xf32>
    %cst_12 = arith.constant dense<0.000000e+00> : vector<1xf32>
    %27 = vector.multi_reduction <add>, %26, %cst_12 [1, 2] : vector<1x16x1xf32> to vector<1xf32>
    %28 = vector.shape_cast %27 : vector<1xf32> to vector<1x1x1xf32>
    %29 = vector.extract %28[0, 0, 0] : f32 from vector<1x1x1xf32>
    %30 = vector.broadcast %29 : f32 to vector<1x8x128xf32>
    %31 = arith.addf %7, %30 : vector<1x8x128xf32>
    %c0_13 = arith.constant 0 : index
    %c0_14 = arith.constant 0 : index
    %c0_15 = arith.constant 0 : index
    %32 = vector.load %arg5[%c0_13, %c0_14, %c0_15] : memref<1x8x128xf32, #tpu.memory_space<vmem>>, vector<1x8x128xf32>
    tpu.vector_store %arg5[%c0_13, %c0_14, %c0_15], %31 {strides = array<i32>} : memref<1x8x128xf32, #tpu.memory_space<vmem>>, vector<1x8x128xf32>,
    return
  }
  func.func @transform_0(%arg0: i32, %arg1: i32) -> (i32, i32) {
    %c1_i32 = arith.constant 1 : i32
    %0 = arith.muli %arg0, %c1_i32 : i32
    %1 = arith.addi %0, %arg1 : i32
    %c0_i32 = arith.constant 0 : i32
    %c0_i32_0 = arith.constant 0 : i32
    return %1, %c0_i32 : i32, i32
  }
  func.func @transform_1(%arg0: i32, %arg1: i32) -> (i32, i32) {
    %c1_i32 = arith.constant 1 : i32
    %0 = arith.muli %arg0, %c1_i32 : i32
    %1 = arith.addi %0, %arg1 : i32
    %c0_i32 = arith.constant 0 : i32
    %c0_i32_0 = arith.constant 0 : i32
    return %1, %c0_i32 : i32, i32
  }
  func.func @transform_2(%arg0: i32, %arg1: i32) -> (i32, i32) {
    %c1_i32 = arith.constant 1 : i32
    %0 = arith.muli %arg0, %c1_i32 : i32
    %1 = arith.addi %0, %arg1 : i32
    %c0_i32 = arith.constant 0 : i32
    %2 = arith.minsi %1, %c0_i32 : i32
    %c0_i32_0 = arith.constant 0 : i32
    %c0_i32_1 = arith.constant 0 : i32
    return %2, %c0_i32_0 : i32, i32
  }
  func.func @transform_3(%arg0: i32, %arg1: i32) -> (i32, i32, i32) {
    %c0_i32 = arith.constant 0 : i32
    %c0_i32_0 = arith.constant 0 : i32
    %c0_i32_1 = arith.constant 0 : i32
    return %arg0, %c0_i32, %c0_i32_0 : i32, i32, i32
  }
}

</mosaic_0001>

<bundles_post_ra>
// kernel: weighted_ce_loss.1
= control target key start
LH: loop header
LB: loop body
LE: loop exit
PB: predicated region body
PF: predicated region fallthrough
CT: control target
= control target key end

     0   :  { %v194_v1 = vmov 0   ;;  %v101_v5 = vlaneseq  ;;  %vm142_vm2 = vcmask 7168   ;;  %s236_s2 = inlined_call_operand.vmem [shape: f32[16,128], index: 2, kind: input, shape index: {}]   ;;  %s237_s0 = inlined_call_operand.vmem [shape: s32[16,1], index: 0, kind: input, shape index: {}]   ;;  %s238_s1 = inlined_call_operand.vmem [shape: f32[16,1], index: 1, kind: input, shape index: {}]   ;;  %s239_s3 = inlined_call_operand.vmem [shape: f32[1,8,128], index: 3, kind: output, shape index: {}]  }
   0x1   :  { %v95_v0 = vld [vmem:[%s236_s2] sm:$0xff]  ;;  %184 = vset.pattern.permute.xlu1 %v194_v1  ;;  %185 = vset.pattern.permute.xlu0 %v194_v1  ;;  %v96_v3 = vld [vmem:[%s236_s2 + $0x8] sm:$0xff] }
   0x2   :  { %v99_v2 = vld [vmem:[%s237_s0] sm:$0xff]  ;;  %104 = vmax.xlane.f32.xlu0 %v95_v0  ;;  %v100_v4 = vld [vmem:[%s237_s0 + $0x8] sm:$0xff]  ;;  %v102_v6 = vand.u32 127, %v101_v5 }
   0x3   :  { %119 = vperm.xlu1 %184, %v99_v2   ;;  %v97_v28 = vld [vmem:[%s238_s1] sm:$0xff]  ;;  %v98_v30 = vld [vmem:[%s238_s1 + $0x8] sm:$0xff] }
   0xa   :  { %106 = vmax.xlane.f32.xlu0 %v96_v3 }
   0xb   :  { %122 = vperm.xlu1 %184, %v100_v4  }
  0x75   :  { %v120_v7 = vpop.permute.xlu1 %119  ;;  %v105_v8 = vpop.xlane.xlu0 %104 }
  0x76   :  { %vm124_vm0 = vcmp.eq.s32.totalorder %v102_v6, %v120_v7  ;;  %v108_v9 = vsub.f32 %v95_v0, %v105_v8 }
  0x77   :  { %v126_v10 = vsel %vm124_vm0, %v95_v0, 0.0 }
  0x78   :  { %128 = vadd.xlane.f32.xlu0 %v126_v10  ;;  %v110_v11 = vmul.f32 1.442695, %v108_v9 }
  0x7a   :  { %186 = vpow2.f32 %v110_v11 }
  0x7d   :  { %v123_v12 = vpop.permute.xlu1 %122  ;;  %v107_v13 = vpop.xlane.xlu0 %106 }
  0x7e   :  { %vm125_vm1 = vcmp.eq.s32.totalorder %v102_v6, %v123_v12  ;;  %v109_v14 = vsub.f32 %v96_v3, %v107_v13 }
  0x7f   :  { %v127_v15 = vsel %vm125_vm1, %v96_v3, 0.0 }
  0x80   :  { %130 = vadd.xlane.f32.xlu1 %v127_v15  ;;  %v187_v16 = vpop.eup %186  ;;  %v112_v17 = vmul.f32 1.442695, %v109_v14 }
  0x81   :  { %114 = vadd.xlane.f32.xlu2 %v187_v16 }
  0x82   :  { %188 = vpow2.f32 %v112_v17 }
  0x88   :  { %v189_v18 = vpop.eup %188 }
  0x89   :  { %116 = vadd.xlane.f32.xlu2 %v189_v18 }
  0xeb   :  { %v129_v24 = vpop.xlane.xlu0 %128 }
  0xf3   :  { %v131_v31 = vpop.xlane.xlu1 %130 }
  0xf4   :  { %v115_v19 = vpop.xlane.xlu2 %114 }
  0xf5   :  { %190 = vlog2.f32 %v115_v19 }
  0xfb   :  { %v191_v20 = vpop.eup %190 }
  0xfc   :  { %v133_v21 = vmul.f32 0.6931472, %v191_v20  ;;  %v117_v22 = vpop.xlane.xlu2 %116 }
  0xfd   :  { %192 = vlog2.f32 %v117_v22 }
  0xfe   :  { %v136_v23 = vadd.f32 %v133_v21, %v105_v8 }
 0x100   :  { %v138_v27 = vsub.f32 %v136_v23, %v129_v24 }
 0x102   :  { %v140_v32 = vmul.f32 %v138_v27, %v97_v28 }
 0x103   :  { %v193_v25 = vpop.eup %192 }
 0x104   :  { %v135_v26 = vmul.f32 0.6931472, %v193_v25  ;;  %v143_v35 = vsel %vm142_vm2, %v140_v32, 0.0 }
 0x106   :  { %v137_v29 = vadd.f32 %v135_v26, %v107_v13 }
 0x108   :  { %v139_v33 = vsub.f32 %v137_v29, %v131_v31 }
 0x10a   :  { %v141_v34 = vmul.f32 %v139_v33, %v98_v30 }
 0x10c   :  { %v144_v36 = vsel %vm142_vm2, %v141_v34, 0.0 }
 0x10d   :  { %v145_v37 = vadd.f32 %v144_v36, %v143_v35 }
 0x10f   :  { %146 = vadd.xlane.f32.xlu2 %v145_v37 }
 0x182   :  { %v147_v38 = vpop.xlane.xlu2 %146 }
 0x183   :  { %v148_v39 = vrot.slane %v147_v38, 4 }
 0x185   :  { %v149_v40 = vadd.f32 %v148_v39, %v147_v38 }
 0x187   :  { %v150_v41 = vrot.slane %v149_v40, 2 }
 0x189   :  { %v151_v42 = vadd.f32 %v150_v41, %v149_v40 }
 0x18b   :  { %v152_v43 = vrot.slane %v151_v42, 1 }
 0x18d   :  { %v153_v44 = vadd.f32 %v152_v43, %v151_v42 }
 0x18f   :  { %180 = vpush %v153_v44 }
 0x1c0   :  { %s181_s22 = spop %180 }
 0x1c1   :  { %v155_v45 = vstv %s181_s22 }
 0x1c2   :  { %157 = vst [vmem:[%s239_s3] sm:$0xff] %v155_v45 }

</bundles_post_ra>
